<compile_context>
chip_gen: v7x
topology: tpu7x:2x2x1
jax: 0.10.0
libtpu: 0.0.40
codegen_flags: <defaults>
</compile_context>

<pallas_src>
import functools

import jax
import jax.numpy as jnp
from jax.experimental import pallas as pl
from jax.experimental.pallas import tpu as pltpu

_MiB = 1024 * 1024


def _pad(n, m):
    return ((n + m - 1) // m) * m


def _physical_vmem_bytes():
    try:
        info = pltpu.get_tpu_info()
        cap = getattr(info, "vmem_capacity_bytes", None)
        if cap:
            return int(cap)
    except Exception:
        pass
    return 64 * _MiB  # conservative fallback (safe on v7x's 64 MiB per TC)


def _vmem_caps():
    """Returns (tile budget, vmem_limit_bytes) for the current TPU generation."""
    phys = _physical_vmem_bytes()
    if phys <= 64 * _MiB:              # v7x: 64 MiB per TensorCore
        return 48 * _MiB, 56 * _MiB
    return 100 * _MiB, 112 * _MiB      # v5e / v6e: 128 MiB physical


def _tile_candidates(total, align, target):
    """Aligned divisors of `total`, descending, <= target.  Falls back to the full extent."""
    cands = []
    t = (min(total, target) // align) * align
    while t >= align:
        if total % t == 0:
            cands.append(t)
        t -= align
    if not cands:
        cands = [total]
    return cands


def _lora_tile_vmem_bytes(tm, tn, din, rr, itemsize):
    """Double-buffered per-step VMEM estimate, incl. padded rank-r operands and xa scratch."""
    rr_lane = _pad(rr, 128)   # r in the lane dim (A's last dim / xa's last dim)
    rr_sub = _pad(rr, 8)      # r in the sublane dim (LoRA-B's first dim)
    per_step = (tm * din          # x tile (resident across j, still double-buffered)
                + din * tn        # W column tile
                + 8 * tn          # bias (1, tn) padded to 8 sublanes
                + din * rr_lane   # LoRA A
                + rr_sub * tn     # LoRA B column tile
                + tm * tn)        # output tile
    return 2 * per_step * itemsize + tm * rr_lane * itemsize


def _choose_tiles(m, n, est_fn, budget, m_align, n_align, tm_target=1024, tn_target=1024):
    """Largest (tm, tn) under the VMEM budget; tm prioritized (cuts W HBM re-reads)."""
    m_c = _tile_candidates(m, m_align, tm_target)
    n_c = _tile_candidates(n, n_align, tn_target)
    for tm in m_c:
        for tn in n_c:
            if est_fn(tm, tn) <= budget:
                return tm, tn
    # TODO(synk): for extremely wide Din where even the smallest pair exceeds the
    # budget, add a K (Din) grid axis with an f32 accumulator scratch.
    return m_c[-1], n_c[-1]


# ---------------------------------------------------------------------------
# Kernel 1: enable_lora is None  (2-D tiled grid over (M, Dout))
# ---------------------------------------------------------------------------
def _lora_dense_kernel_cached(x_ref, w_ref, b_ref, a_ref, bb_ref, o_ref, xa_ref, *, scale):
    """x@A cached once per M-tile (inner Dout axis marked 'arbitrary')."""
    j = pl.program_id(1)

    @pl.when(j == 0)
    def _():
        xa = scale * jnp.dot(x_ref[...], a_ref[...], preferred_element_type=jnp.float32)
        # Stored in the input dtype so the delta matmul stays on the bf16 MXU path.
        xa_ref[...] = xa.astype(xa_ref.dtype)

    origin = jnp.dot(x_ref[...], w_ref[...],
                     preferred_element_type=jnp.float32) + b_ref[...]
    delta = jnp.dot(xa_ref[...], bb_ref[...], preferred_element_type=jnp.float32)
    o_ref[...] = (origin + delta).astype(o_ref.dtype)


def _lora_dense_kernel_recompute(x_ref, w_ref, b_ref, a_ref, bb_ref, o_ref, *, scale):
    """Scratch-free variant: both axes 'parallel' (megacore-friendly when M//tm == 1)."""
    x = x_ref[...]
    origin = jnp.dot(x, w_ref[...], preferred_element_type=jnp.float32) + b_ref[...]
    xa = (scale * jnp.dot(x, a_ref[...], preferred_element_type=jnp.float32)).astype(x.dtype)
    delta = jnp.dot(xa, bb_ref[...], preferred_element_type=jnp.float32)
    o_ref[...] = (origin + delta).astype(o_ref.dtype)


def lora_forward_dense(x2d, w, b2d, A, Bm, *, alpha, r, tm=None, tn=None):
    M, Din = x2d.shape
    Dout = w.shape[1]
    rr = A.shape[1]
    scale = float(alpha) / float(r)
    itemsize = jnp.dtype(x2d.dtype).itemsize
    m_align = 16 if itemsize <= 2 else 8
    n_align = 256 if Dout % 256 == 0 else 128

    budget, vmem_limit = _vmem_caps()
    est_fn = lambda a, b: _lora_tile_vmem_bytes(a, b, Din, rr, itemsize)
    auto_tm, auto_tn = _choose_tiles(M, Dout, est_fn, budget, m_align, n_align)
    tm = auto_tm if tm is None else tm
    tn = auto_tn if tn is None else tn
    assert M % tm == 0 and Dout % tn == 0
    grid_m, grid_n = M // tm, Dout // tn
    use_cached = grid_m > 1 and grid_n > 1

    in_specs = [
        pl.BlockSpec((tm, Din), lambda i, j: (i, 0)),   # x: resident across j
        pl.BlockSpec((Din, tn), lambda i, j: (0, j)),   # W column tile
        pl.BlockSpec((1, tn), lambda i, j: (0, j)),     # bias tile
        pl.BlockSpec((Din, rr), lambda i, j: (0, 0)),   # LoRA A (whole)
        pl.BlockSpec((rr, tn), lambda i, j: (0, j)),    # LoRA B column tile
    ]
    out_spec = pl.BlockSpec((tm, tn), lambda i, j: (i, j))

    if use_cached:
        kernel = functools.partial(_lora_dense_kernel_cached, scale=scale)
        scratch = [pltpu.VMEM((tm, rr), x2d.dtype)]      # cached scale*(x@A)
        semantics = ("parallel", "arbitrary")
    else:
        # Single M block (or single Dout block): recompute the tiny rank-r matmul
        # per tile and keep both grid axes "parallel" so v7x megacore can shard j.
        kernel = functools.partial(_lora_dense_kernel_recompute, scale=scale)
        scratch = []
        semantics = ("parallel", "parallel")

    return pl.pallas_call(
        kernel,
        out_shape=jax.ShapeDtypeStruct((M, Dout), x2d.dtype),
        grid_spec=pltpu.PrefetchScalarGridSpec(
            num_scalar_prefetch=0,
            grid=(grid_m, grid_n),
            in_specs=in_specs,
            out_specs=out_spec,
            scratch_shapes=scratch,
        ),
        compiler_params=pltpu.CompilerParams(
            dimension_semantics=semantics,
            vmem_limit_bytes=int(vmem_limit),
        ),
    )(x2d, w, b2d, A, Bm)


# ---------------------------------------------------------------------------
# Kernel 2: enable_lora list  (grid = (M tiles, segments, seg//tn); scalar
# prefetch carries per-segment LoRA index + enable flag; disabled segments
# skip both LoRA matmuls via pl.when)
# ---------------------------------------------------------------------------
def _lora_seg_kernel(idx_ref, en_ref, x_ref, w_ref, b_ref, a_ref, bb_ref, o_ref, *, scale):
    k = pl.program_id(1)
    x = x_ref[...]
    origin = jnp.dot(x, w_ref[...], preferred_element_type=jnp.float32) + b_ref[...]

    @pl.when(en_ref[k] != 0)
    def _enabled():
        xa = (scale * jnp.dot(x, a_ref[...],
                              preferred_element_type=jnp.float32)).astype(x.dtype)
        delta = jnp.dot(xa, bb_ref[...], preferred_element_type=jnp.float32)
        o_ref[...] = (origin + delta).astype(o_ref.dtype)

    @pl.when(en_ref[k] == 0)
    def _disabled():
        o_ref[...] = origin.astype(o_ref.dtype)


def lora_forward_segmented(x2d, w, b2d, A_st, B_st, lora_idx, enable_i32,
                           *, alpha, r, tm=None, tn=None):
    M, Din = x2d.shape
    Dout = w.shape[1]
    n_seg = int(enable_i32.shape[0])
    assert Dout % n_seg == 0
    seg = Dout // n_seg
    # Lane-dense output stores: each segment must map to whole 128-lane tiles.
    assert seg % 128 == 0, f"seg_dim={seg} must be a multiple of 128"
    rr = A_st.shape[2]
    scale = float(alpha) / float(r)
    itemsize = jnp.dtype(x2d.dtype).itemsize
    m_align = 16 if itemsize <= 2 else 8
    n_align = 256 if seg % 256 == 0 else 128

    budget, vmem_limit = _vmem_caps()
    est_fn = lambda a, b: _lora_tile_vmem_bytes(a, b, Din, rr, itemsize)
    auto_tm, auto_tn = _choose_tiles(M, seg, est_fn, budget, m_align, n_align)
    tm = auto_tm if tm is None else tm
    tn = auto_tn if tn is None else tn
    assert M % tm == 0 and seg % tn == 0
    n_inner = seg // tn
    grid = (M // tm, n_seg, n_inner)

    in_specs = [
        pl.BlockSpec((tm, Din), lambda i, k, j, idx, en: (i, 0)),
        pl.BlockSpec((Din, tn), lambda i, k, j, idx, en: (0, k * n_inner + j)),
        pl.BlockSpec((1, tn), lambda i, k, j, idx, en: (0, k * n_inner + j)),
        pl.BlockSpec((pl.Squeezed(), Din, rr),
                     lambda i, k, j, idx, en: (idx[k], 0, 0)),
        pl.BlockSpec((pl.Squeezed(), rr, tn),
                     lambda i, k, j, idx, en: (idx[k], 0, j)),
    ]
    out_spec = pl.BlockSpec((tm, tn), lambda i, k, j, idx, en: (i, k * n_inner + j))

    kernel = functools.partial(_lora_seg_kernel, scale=scale)
    return pl.pallas_call(
        kernel,
        out_shape=jax.ShapeDtypeStruct((M, Dout), x2d.dtype),
        grid_spec=pltpu.PrefetchScalarGridSpec(
            num_scalar_prefetch=2,
            grid=grid,
            in_specs=in_specs,
            out_specs=out_spec,
        ),
        compiler_params=pltpu.CompilerParams(
            dimension_semantics=("parallel", "parallel", "parallel"),
            vmem_limit_bytes=int(vmem_limit),
        ),
    )(lora_idx, enable_i32, x2d, w, b2d, A_st, B_st)


def build_segment_tables(enable_lora, A_list, B_list, input_dim, r, seg_dim, dtype):
    """Stacked LoRA params + per-segment (index, enable) tables; handles n_en == 0."""
    n_en = sum(1 for e in enable_lora if e)
    if n_en == 0:
        A_st = jnp.zeros((1, input_dim, r), dtype)
        B_st = jnp.zeros((1, r, seg_dim), dtype)
    else:
        A_st = jnp.stack(A_list).astype(dtype)
        B_st = jnp.stack(B_list).astype(dtype)
    lora_idx, en, i = [], [], 0
    for e in enable_lora:
        lora_idx.append(i if e else 0)
        en.append(1 if e else 0)
        if e:
            i += 1
    return A_st, B_st, jnp.asarray(lora_idx, jnp.int32), jnp.asarray(en, jnp.int32)


# ---------------------------------------------------------------------------
# Pure-JAX references (mirror the PyTorch forward exactly)
# ---------------------------------------------------------------------------
def ref_dense(x, w, b, A, Bm, alpha, r):
    origin = x @ w + b
    return origin + (alpha / r) * ((x @ A) @ Bm)


def ref_segmented(x, w, b, A_list, B_list, enable, alpha, r):
    out_shape = x.shape[:-1] + (w.shape[1],)
    origin = (x @ w + b).reshape(-1, w.shape[1])
    x2d = x.reshape(-1, x.shape[-1])
    seg = w.shape[1] // len(enable)
    i = 0
    for k, en in enumerate(enable):
        if en:
            cash = (alpha / r) * ((x2d @ A_list[i]) @ B_list[i])
            origin = origin.at[:, k * seg:(k + 1) * seg].add(cash)
            i += 1
    return origin.reshape(out_shape)


if __name__ == "__main__":
    batch, seq = 2, 8
    input_dim, output_dim = 32, 384
    r, alpha = 4, 8
    enable_lora = [True, False, True]
    n_seg = len(enable_lora)
    seg_dim = output_dim // n_seg
    n_en = sum(enable_lora)

    key = jax.random.PRNGKey(0)
    kx, kx2, kw, kb, ka, kbm, kal, kbl = jax.random.split(key, 8)

    x = jax.random.normal(kx, (batch, seq, input_dim), jnp.float32)

    # base model = Linear(input_dim, output_dim), deterministic init
    w = jax.random.normal(kw, (input_dim, output_dim), jnp.float32) * 0.05
    b = jax.random.normal(kb, (output_dim,), jnp.float32) * 0.05
    b2d = b.reshape(1, output_dim)

    # LoRA params (in __init__ lora_B is zeros; random here so the matmul path is
    # actually exercised — the forward semantics are identical).
    A = jax.random.uniform(ka, (input_dim, r), jnp.float32)
    Bm = jax.random.normal(kbm, (r, output_dim), jnp.float32) * 0.1

    A_list = [jax.random.uniform(jax.random.fold_in(kal, i),
                                 (input_dim, r), jnp.float32) for i in range(n_en)]
    B_list = [jax.random.normal(jax.random.fold_in(kbl, i),
                                (r, seg_dim), jnp.float32) * 0.1 for i in range(n_en)]

    x2d = x.reshape(-1, input_dim)
    want_dense = ref_dense(x, w, b, A, Bm, alpha, r)

    # ----- branch 1 (enable_lora is None): cached-xa kernel on a real 2-D grid -----
    out1 = lora_forward_dense(x2d, w, b2d, A, Bm, alpha=alpha, r=r, tm=8, tn=128)
    out1 = out1.reshape(batch, seq, output_dim)
    jax.block_until_ready(out1)
    assert jnp.allclose(out1, want_dense, atol=1e-4, rtol=1e-4)

    # ----- branch 1, auto-sized tiles (single M block -> megacore-friendly recompute) -----
    out2 = lora_forward_dense(x2d, w, b2d, A, Bm, alpha=alpha, r=r)
    out2 = out2.reshape(batch, seq, output_dim)
    jax.block_until_ready(out2)
    assert jnp.allclose(out2, want_dense, atol=1e-4, rtol=1e-4)

    # ----- branch 1 with bf16 MXU inputs (f32 accumulation, bf16 LoRA intermediate) -----
    xb = jax.random.normal(kx2, (4, seq, input_dim), jnp.float32)
    xb2d = xb.reshape(-1, input_dim)
    want_b = ref_dense(xb, w, b, A, Bm, alpha, r)
    out3 = lora_forward_dense(xb2d.astype(jnp.bfloat16), w.astype(jnp.bfloat16), b2d,
                              A.astype(jnp.bfloat16), Bm.astype(jnp.bfloat16),
                              alpha=alpha, r=r, tm=16, tn=128)
    out3 = out3.reshape(4, seq, output_dim).astype(jnp.float32)
    jax.block_until_ready(out3)
    assert jnp.allclose(out3, want_b, atol=2.5e-1, rtol=5e-2)

    # ----- branch 2: enable_lora = [True, False, True] -----
    A_st, B_st, lora_idx, enable_i32 = build_segment_tables(
        enable_lora, A_list, B_list, input_dim, r, seg_dim, jnp.float32)
    out4 = lora_forward_segmented(x2d, w, b2d, A_st, B_st, lora_idx, enable_i32,
                                  alpha=alpha, r=r, tm=8)
    out4 = out4.reshape(batch, seq, output_dim)
    jax.block_until_ready(out4)
    want_seg = ref_segmented(x, w, b, A_list, B_list, enable_lora, alpha, r)
    assert jnp.allclose(out4, want_seg, atol=1e-4, rtol=1e-4)

    # ----- branch 2, all segments disabled (n_en == 0 robustness) -----
    A0, B0, idx0, en0 = build_segment_tables([False] * n_seg, [], [],
                                             input_dim, r, seg_dim, jnp.float32)
    out5 = lora_forward_segmented(x2d, w, b2d, A0, B0, idx0, en0,
                                  alpha=alpha, r=r, tm=8)
    jax.block_until_ready(out5)
    want5 = x2d @ w + b
    assert jnp.allclose(out5, want5, atol=1e-4, rtol=1e-4)

    print("KERNEL_OK")
</pallas_src>

<mosaic_0001>
module attributes {stable_mosaic.version = 11 : i64} {
  func.func @_lora_dense_kernel_cached(%arg0: i32, %arg1: i32, %arg2: memref<8x32xf32, #tpu.memory_space<vmem>>, %arg3: memref<32x128xf32, #tpu.memory_space<vmem>>, %arg4: memref<1x128xf32, #tpu.memory_space<vmem>>, %arg5: memref<32x4xf32, #tpu.memory_space<vmem>>, %arg6: memref<4x128xf32, #tpu.memory_space<vmem>>, %arg7: memref<8x128xf32, #tpu.memory_space<vmem>>, %arg8: memref<8x4xf32, #tpu.memory_space<vmem>>) attributes {dimension_semantics = [#tpu.dimension_semantics<parallel>, #tpu.dimension_semantics<arbitrary>], iteration_bounds = array<i64: 2, 3>, scalar_prefetch = 0 : i64, scratch_operands = 1 : i64, tpu.core_type = #tpu.core_type<tc>, window_params = [{transform_indices = @transform_0, window_bounds = array<i64: 8, 32>}, {transform_indices = @transform_1, window_bounds = array<i64: 32, 128>}, {transform_indices = @transform_2, window_bounds = array<i64: 1, 128>}, {pipeline_mode = #tpu.pipeline_mode<synchronous>, transform_indices = @transform_3, window_bounds = array<i64: 32, 4>}, {transform_indices = @transform_4, window_bounds = array<i64: 4, 128>}, {transform_indices = @transform_5, window_bounds = array<i64: 8, 128>}]} {
    %c0_i32 = arith.constant 0 : i32
    %0 = arith.cmpi eq, %arg1, %c0_i32 : i32
    %1 = arith.extui %0 : i1 to i32
    %c0_i32_0 = arith.constant 0 : i32
    %2 = arith.cmpi ne, %1, %c0_i32_0 : i32
    scf.if %2 {
      %c0_13 = arith.constant 0 : index
      %c0_14 = arith.constant 0 : index
      %14 = vector.load %arg2[%c0_13, %c0_14] : memref<8x32xf32, #tpu.memory_space<vmem>>, vector<8x32xf32>
      %c0_15 = arith.constant 0 : index
      %c0_16 = arith.constant 0 : index
      %15 = vector.load %arg5[%c0_15, %c0_16] : memref<32x4xf32, #tpu.memory_space<vmem>>, vector<32x4xf32>
      %cst_17 = arith.constant dense<0.000000e+00> : vector<8x4xf32>
      %16 = tpu.matmul %14, %15, %cst_17 {dimension_numbers = #tpu.dot_dimension_numbers<[1], [0], [0], [1], [0, 0, 1, 1], [], []>} : vector<8x32xf32>, vector<32x4xf32>, vector<8x4xf32> -> vector<8x4xf32>
      %cst_18 = arith.constant 2.000000e+00 : f32
      %17 = vector.broadcast %cst_18 : f32 to vector<8x4xf32>
      %18 = arith.mulf %17, %16 : vector<8x4xf32>
      %c0_19 = arith.constant 0 : index
      %c0_20 = arith.constant 0 : index
      %19 = vector.load %arg8[%c0_19, %c0_20] : memref<8x4xf32, #tpu.memory_space<vmem>>, vector<8x4xf32>
      tpu.vector_store %arg8[%c0_19, %c0_20], %18 {strides = array<i32>} : memref<8x4xf32, #tpu.memory_space<vmem>>, vector<8x4xf32>,
    } else {
    }
    %c0 = arith.constant 0 : index
    %c0_1 = arith.constant 0 : index
    %3 = vector.load %arg2[%c0, %c0_1] : memref<8x32xf32, #tpu.memory_space<vmem>>, vector<8x32xf32>
    %c0_2 = arith.constant 0 : index
    %c0_3 = arith.constant 0 : index
    %4 = vector.load %arg3[%c0_2, %c0_3] : memref<32x128xf32, #tpu.memory_space<vmem>>, vector<32x128xf32>
    %cst = arith.constant dense<0.000000e+00> : vector<8x128xf32>
    %5 = tpu.matmul %3, %4, %cst {dimension_numbers = #tpu.dot_dimension_numbers<[1], [0], [0], [1], [0, 0, 1, 1], [], []>} : vector<8x32xf32>, vector<32x128xf32>, vector<8x128xf32> -> vector<8x128xf32>
    %c0_4 = arith.constant 0 : index
    %c0_5 = arith.constant 0 : index
    %6 = vector.load %arg4[%c0_4, %c0_5] : memref<1x128xf32, #tpu.memory_space<vmem>>, vector<1x128xf32>
    %7 = vector.broadcast %6 : vector<1x128xf32> to vector<8x128xf32>
    %8 = arith.addf %5, %7 : vector<8x128xf32>
    %c0_6 = arith.constant 0 : index
    %c0_7 = arith.constant 0 : index
    %9 = vector.load %arg8[%c0_6, %c0_7] : memref<8x4xf32, #tpu.memory_space<vmem>>, vector<8x4xf32>
    %c0_8 = arith.constant 0 : index
    %c0_9 = arith.constant 0 : index
    %10 = vector.load %arg6[%c0_8, %c0_9] : memref<4x128xf32, #tpu.memory_space<vmem>>, vector<4x128xf32>
    %cst_10 = arith.constant dense<0.000000e+00> : vector<8x128xf32>
    %11 = tpu.matmul %9, %10, %cst_10 {dimension_numbers = #tpu.dot_dimension_numbers<[1], [0], [0], [1], [0, 0, 1, 1], [], []>} : vector<8x4xf32>, vector<4x128xf32>, vector<8x128xf32> -> vector<8x128xf32>
    %12 = arith.addf %8, %11 : vector<8x128xf32>
    %c0_11 = arith.constant 0 : index
    %c0_12 = arith.constant 0 : index
    %13 = vector.load %arg7[%c0_11, %c0_12] : memref<8x128xf32, #tpu.memory_space<vmem>>, vector<8x128xf32>
    tpu.vector_store %arg7[%c0_11, %c0_12], %12 {strides = array<i32>} : memref<8x128xf32, #tpu.memory_space<vmem>>, vector<8x128xf32>,
    return
  }
  func.func @transform_0(%arg0: i32, %arg1: i32) -> (i32, i32) {
    %c0_i32 = arith.constant 0 : i32
    %c0_i32_0 = arith.constant 0 : i32
    return %arg0, %c0_i32 : i32, i32
  }
  func.func @transform_1(%arg0: i32, %arg1: i32) -> (i32, i32) {
    %c0_i32 = arith.constant 0 : i32
    %c0_i32_0 = arith.constant 0 : i32
    return %c0_i32, %arg1 : i32, i32
  }
  func.func @transform_2(%arg0: i32, %arg1: i32) -> (i32, i32) {
    %c0_i32 = arith.constant 0 : i32
    %c0_i32_0 = arith.constant 0 : i32
    return %c0_i32, %arg1 : i32, i32
  }
  func.func @transform_3(%arg0: i32, %arg1: i32) -> (i32, i32) {
    %c0_i32 = arith.constant 0 : i32
    %c0_i32_0 = arith.constant 0 : i32
    %c0_i32_1 = arith.constant 0 : i32
    return %c0_i32, %c0_i32_0 : i32, i32
  }
  func.func @transform_4(%arg0: i32, %arg1: i32) -> (i32, i32) {
    %c0_i32 = arith.constant 0 : i32
    %c0_i32_0 = arith.constant 0 : i32
    return %c0_i32, %arg1 : i32, i32
  }
  func.func @transform_5(%arg0: i32, %arg1: i32) -> (i32, i32) {
    %c0_i32 = arith.constant 0 : i32
    return %arg0, %arg1 : i32, i32
  }
}

</mosaic_0001>

<bundles_post_ra>
// kernel: tpu_custom_call.1
= control target key start
LH: loop header
LB: loop body
LE: loop exit
PB: predicated region body
PF: predicated region fallthrough
CT: control target
= control target key end

     0   :  { %s1347_s0 = inlined_call_operand.vmem [shape: f32[16,32], index: 0, kind: input, shape index: {}]   ;;  %s1348_s1 = inlined_call_operand.hbm [shape: f32[32,384], index: 1, kind: input, shape index: {}]   ;;  %s1349_s2 = inlined_call_operand.vmem [shape: f32[1,384], index: 2, kind: input, shape index: {}]   ;;  %s1350_s3 = inlined_call_operand.vmem [shape: f32[32,4], index: 3, kind: input, shape index: {}]   ;;  %s1351_s4 = inlined_call_operand.vmem [shape: f32[4,384], index: 4, kind: input, shape index: {}]   ;;  %s1352_s5 = inlined_call_operand.hbm [shape: f32[16,384], index: 5, kind: output, shape index: {}]  }
   0x1   :  { %1361 = sst [smem:[#allocation16_spill]] %s1348_s1 }
   0x2   :  { %10 = vsyncpa [#allocation4], 0 }
   0x3   :  { %12 = vsyncpa [#allocation4 + $0x1], 0 }
   0x4   :  { %13 = vsyncpa [#allocation5], 0 }
   0x5   :  { %15 = vsyncpa [#allocation5 + $0x1], 0  ;;  %s1071_s18 = smov 0   ;;  %s1073_s19 = smov 0  }
   0x6   :  { %s1075_s20 = smov 0   ;;  %s1077_s21 = smov 0  }
   0x7   :  { %s1079_s22 = smov 0   ;;  %s1081_s23 = smov 0  }
   0x8   :  { %s1083_s24 = smov 0   ;;  %s1085_s25 = smov 0  }
   0x9   :  { %s1087_s26 = smov 0   ;;  %s1089_s27 = smov 0  }
   0xa   :  { %s1091_s28 = smov 0  }
   0xb LB: > { %1362 = sst [smem:[#allocation9_spill]] %s1004_s22  ;;  %s690_s29 = sadd.s32 4294967295, %s1028_s28   ;;  %s1028_s28 = sphi %s1091_s28, %s21_s28   ;;  %s1024_s27 = sphi %s1089_s27, %s1384_s27   ;;  %s1020_s26 = sphi %s1087_s26, %s1383_s26   ;;  %s1016_s25 = sphi %s1085_s25, %s1382_s25   ;;  %s1012_s24 = sphi %s1083_s24, %s1381_s24   ;;  %s1008_s23 = sphi %s1081_s23, %s1380_s23   ;;  %s1004_s22 = sphi %s1079_s22, %s1379_s22   ;;  %s1000_s21 = sphi %s1077_s21, %s1378_s21   ;;  %s996_s20 = sphi %s1075_s20, %s1387_s20   ;;  %s992_s19 = sphi %s1073_s19, %s1386_s19   ;;  %s988_s18 = sphi %s1071_s18, %s1385_s18  }
   0xc   : > { %1363 = sst [smem:[#allocation10_spill]] %s1008_s23  ;;  %s691_s30 = sadd.s32 4294967294, %s1028_s28  }
   0xd   : > { %1364 = sst [smem:[#allocation11_spill]] %s1020_s26  ;;  %s30_s6 = sadd.s32 1, %s1020_s26 }
   0xe   : > { %1365 = sst [smem:[#allocation12_spill]] %s1024_s27  ;;  %s33_s7 = sadd.s32 1, %s1024_s27 }
   0xf   : > { %p31_p0 = scmp.ge.s32.totalorder %s30_s6, 3  ;;  %s66_s8 = sadd.s32 1, %s1008_s23 }
  0x10   : > { %p73_p1 = scmp.ne.s32.totalorder %s1008_s23, %s1004_s22  ;;  %p74_p2 = scmp.eq.s32.totalorder %s1028_s28, 0 }
  0x11   : > { %s1389_s6 = smov (%p31_p0, %s30_s6), 0  ;;  %s1391_s7 = smov (!%p31_p0, %s33_s7), %s1024_s27 }
  0x12   : > { %1366 = sst [smem:[#allocation13_spill]] %s1389_s6  ;;  %s63_s9 = ssub.s32 %s1020_s26, %s1389_s6 }
  0x13   : > { %p1137_p3 = por %p74_p2, %p73_p1  ;;  %p35_p4 = scmp.ge.s32.totalorder %s1391_s7, 2 }
  0x14   : > { %p64_p5 = scmp.eq.s32.totalorder %s63_s9, 0  ;;  %p79_p6 = scmp.ne.s32.totalorder %s1004_s22, %s1000_s21 }
  0x15   : > { %p80_p7 = scmp.eq.s32.totalorder %s690_s29, 0  ;;  %s1393_s7 = smov (%p35_p4, %s1391_s7), 0 }
  0x16   : > { %1368 = sst [smem:[#allocation14_spill]] %s1393_s7  ;;  %s162_s13 = ssub.s32 %s1024_s27, %s1393_s7 }
  0x17   : > { %s1145_s11 = scalar_select %p64_p5, %s1008_s23, %s66_s8  }
  0x18   : > { %p1147_p8 = por %p80_p7, %p79_p6  ;;  %s164_s14 = sor.u32 %s162_s13, %s63_s9 }
  0x19   : > { %1369 = sst [smem:[#allocation15_spill]] %s1145_s11  ;;  %s167_s15 = sadd.s32 1, %s996_s20 }
  0x1a   : > { %p165_p9 = scmp.eq.s32.totalorder %s164_s14, 0  ;;  %p177_p10 = scmp.ne.s32.totalorder %s996_s20, %s992_s19 }
  0x1b   : > { %p178_p11 = scmp.eq.s32.totalorder %s690_s29, 5  ;;  %p183_p12 = scmp.ne.s32.totalorder %s992_s19, %s988_s18 }
  0x1c   : > { %s1159_s16 = scalar_select %p165_p9, %s996_s20, %s167_s15  }
  0x1d   : > { %p1161_p13 = por %p178_p11, %p177_p10  ;;  %p184_p0 = scmp.eq.s32.totalorder %s691_s30, 5 }
  0x1e   : > { %p777_p1 = scmp.lt.s32.totalorder %s1028_s28, 6  ;;  %s214_s8 = sand.u32 1, %s1008_s23  }
  0x1f   : > { %s1371_s17 = scalar_select %p1161_p13, 1, 0 }
  0x20   : > { %p1166_p2 = por %p184_p0, %p183_p12  ;;  %s694_s9 = sshll.u32 %s214_s8, 5 }
  0x21   : > { %s695_s13 = sshll.u32 %s1020_s26, 7  ;;  %s1373_s1 = sld [smem:[#allocation16_spill]] }
  0x22   : > { %s1372_s21 = scalar_select %p1166_p2, 1, 0 }
  0x23   : > { %s218_s15 = scalar_lea.vmem [#allocation3], %s694_s9  ;;  %p1181_p4 = pnand %p777_p1, %p1137_p3 }
  0x24   : > { %s224_s6 = sshll.u32 %s218_s15, 4  ;;  %s1185_s27 = scalar_lea.sflag [#allocation4], %s214_s8  ;;  %s1177_s6 = int_to_ptr.vmem [resolvable:$true] %s224_s6 }
  0x25   : > { %p878_p6 = pneg %p1181_p4 }
  0x27   : > { %s1175_s29 = scalar_lea.hbm %s1373_s1, %s695_s13  ;;  %s881_s10 = scalar_lea.hbm %s1373_s1, 1536 }
  0x28   : > { %s876_s7 = scalar_lea.hbm %s1175_s29, 512  ;;  %p882_p3 = scmp.lt.u32.totalorder %s1175_s29, %s1373_s1 }
  0x29   : > { %p877_p5 = scmp.ne.s32.totalorder %s1175_s29, %s876_s7  ;;  %p883_p10 = scmp.lt.u32.totalorder %s881_s10, %s876_s7 }
  0x2a   : > { %p885_p12 = scmp.lt.u32.totalorder %s876_s7, %s1175_s29 }
  0x2b   : > { %p879_p7 = pnand %p878_p6, %p877_p5  ;;  %p884_p11 = por %p883_p10, %p882_p3 }
  0x2d   : > { %p880_p9 = pneg %p879_p7  ;;  %p886_p0 = por %p885_p12, %p884_p11 }
  0x2f   : > { %p887_p1 = pnand %p886_p0, %p880_p9 }
  0x31   : > { %890 = shalt.err (!%p887_p1)
}
  0x32   : > { %s891_s8 = scalar_lea.vmem %s1177_s6, 512  ;;  %s1030_s9 = smov [#allocation3]  }
  0x33   : > { %p892_p5 = scmp.ne.s32.totalorder %s1177_s6, %s891_s8  ;;  %s896_s13 = sshll.u32 %s1030_s9, 4  ;;  %s897_s13 = int_to_ptr.vmem [resolvable:$false] %s896_s13 }
  0x34   : > { %s898_s14 = scalar_lea.vmem %s897_s13, 1024  ;;  %p899_p13 = scmp.lt.s32.totalorder %s1177_s6, %s897_s13 }
  0x35   : > { %p894_p7 = pnand %p892_p5, %p878_p6  ;;  %p900_p3 = scmp.lt.s32.totalorder %s898_s14, %s891_s8 }
  0x37   : > { %p895_p2 = pneg %p894_p7  ;;  %p901_p10 = por %p900_p3, %p899_p13 }
  0x39   : > { %p902_p11 = pnand %p901_p10, %p895_p2 }
  0x3b   : > { %905 = shalt.err (!%p902_p11)
}
  0x3c   : > { %s1031_s7 = smov 384   ;;  %s1032_s10 = smov 128  }
  0x3d   : > { %s1033_s15 = smov 8   ;;  %p696_p6 = scmp.ge.s32.totalorder %s1028_s28, 1 }
  0x3e   : > { %772 = dma.hbm_to_vmem [thread:$0]  (!%p1181_p4), %s1175_s29, 512, %s1177_s6, %s1185_s27, %s1031_s7, %s1032_s10, %s1033_s15  }
  0x3f   : > { %p245_p9 = scmp.lt.s32.totalorder %s1028_s28, 7 }
  0x41   : > { %p246_p12 = pnand %p696_p6, %p245_p9 }
  0x42   : > { %s251_s8 = sand.u32 (!%p246_p12), 1, %s1004_s22  }
  0x43   : > { %249 = sbr.rel (%p246_p12) target bundleno = 547 (0x223), region = 40  ;;  %s697_s9 = sshll.u32 (!%p246_p12), %s251_s8, 5 }
  0x44   : > { %s252_s13 = scalar_lea.sflag (!%p246_p12), [#allocation4], %s251_s8  ;;  %s1216_s14 = scalar_lea.vmem (!%p246_p12), [#allocation3], %s697_s9 }
  0x4a   : > { %979 = dma.done.wait (%p1147_p8), %s252_s13, 512  }
  0x4b   : > { %981 = vsyncadd (%p1147_p8), %s252_s13, 4294966784  ;;  %s1357_s27 = sand.u32 1, %s992_s19   ;;  %p293_p13 = scmp.lt.s32.totalorder %s1016_s25, 1 }
  0x4c   : > { %s1226_s6 = sshll.u32 %s1357_s27, 3  ;;  %p297_p2 = scmp.lt.s32.totalorder %s1012_s24, 2 }
  0x4d   : > { %s294_s29 = scalar_select %p293_p13, %s1016_s25, 1 }
  0x4e   : > { %s1231_s30 = scalar_select %p297_p2, %s1012_s24, 2 }
  0x4f   : > { %s699_s12 = sshll.u32 %s294_s29, 3  ;;  %s292_s23 = scalar_lea.vmem [#allocation6], %s1226_s6 }
  0x50   : > { %s1236_s15 = scalar_lea.vmem %s1347_s0, %s699_s12  ;;  %s299_s13 = scalar_lea.vmem %s1349_s2, %s1231_s30 }
  0x51   : > { %s700_s1 = sshll.u32 %s1231_s30, 2  ;;  %p701_p8 = scmp.ne.s32.totalorder %s1012_s24, 0 }
  0x52   : > { %s1246_s11 = scalar_lea.vmem %s1351_s4, %s700_s1  ;;  %v309_v0 = vld [vmem:[%s1350_s3] sm:$0xff] (!%p701_p8)  ;;  %v310_v1 = vld [vmem:[%s1350_s3 + $0x8] sm:$0xff] (!%p701_p8)  ;;  %v311_v2 = vld [vmem:[%s1350_s3 + $0x10] sm:$0xff] (!%p701_p8)  ;;  %v1034_v3 = vmov (!%p701_p8), 0.0|0.0   ;;  %vm1035_vm0 = vmmov (!%p701_p8), 0   ;;  %v1036_v6 = vmov (!%p701_p8), 0.0  }
  0x53   : > { %307 = sbr.rel (%p701_p8) target bundleno = 307 (0x133), region = 48  ;;  %750 = vmatprep.subr.bf16.mxu0 (!%p701_p8), %v1034_v3  ;;  %v751_v4 = vpack.c.bf16 (!%p701_p8), %v310_v1, %v309_v0  ;;  %v312_v5 = vld [vmem:[%s1350_s3 + $0x18] sm:$0xff] (!%p701_p8)  ;;  %731 = vmatprep.mubr.msk.f32.mxu0 (!%p701_p8), %vm1035_vm0, %v1036_v6  ;;  %v308_v8 = vld [vmem:[%s1236_s15] sm:$0xff] (!%p701_p8)  ;;  %vm313_vm1 = vcmask (!%p701_p8), 261120   ;;  %vm388_vm2 = vcmask (!%p701_p8), 31744  }
  0x54   : > { %v754_v7 = vpack.c.bf16 (!%p701_p8), %v312_v5, %v311_v2 }
  0x55   : > { %752 = vmatpush3.bf16.msra.mxu0 (!%p701_p8), %v751_v4 }
  0x56   : > { %753 = vmatprep.subr.bf16.mxu0 (!%p701_p8), %v1034_v3 }
  0x59   : > { %755 = vmatpush3.bf16.msra.mxu0 (!%p701_p8), %v754_v7 }
  0x5c   : > { %732 = vmatmul.mubr.msk.f32.vlgmr.msra.gmra.mrb[0].mxu0 %vm313_vm1, %v308_v8 }
 0x12f   : > { %v383_v9 = vpop.f32.mrb[0].mxu0 }
 0x130   : > { %v387_v10 = vmul.f32 2.0, %v383_v9  ;;  %v733_v11 = vpop.f32.mrb[1].mxu0 }
 0x132   : > { %389 = vst.msk [vmem:[#allocation2] sm:$0xff] %vm388_vm2, %v387_v10 }
 0x133 PF: > { %v391_v12 = vld [vmem:[%s1216_s14] sm:$0xff]  ;;  %v392_v13 = vld [vmem:[%s1216_s14 + $0x8] sm:$0xff]  ;;  %v393_v14 = vld [vmem:[%s1216_s14 + $0x10] sm:$0xff]  ;;  %v1037_v15 = vmov 0.0|0.0   ;;  %vm1038_vm3 = vmmov 0   ;;  %v1039_v18 = vmov 0.0  }
 0x134   : > { %756 = vmatprep.subr.bf16.mxu1 %v1037_v15  ;;  %v757_v16 = vpack.c.bf16 %v392_v13, %v391_v12  ;;  %v394_v17 = vld [vmem:[%s1216_s14 + $0x18] sm:$0xff]  ;;  %742 = vmatprep.mubr.msk.f32.mxu1 %vm1038_vm3, %v1039_v18  ;;  %vm482_vm4 = vcmask 1043456   ;;  %vm478_vm5 = vcmask 31744   ;;  %vm402_vm6 = vcmask 261120   ;;  %s764_s22 = smul.u32 3, %s1016_s25  ;;  %s574_s29 = sshll.u32 %s292_s23, 4  ;;  %s1283_s29 = int_to_ptr.vmem [resolvable:$true] %s574_s29 }
 0x135   : > { %v477_v19 = vld [vmem:[%s1246_s11] sm:$0xf]  ;;  %745 = vmatprep.subr.mxu0 %v1039_v18  ;;  %747 = vmatprep.mubr.msk.f32.mxu0 %vm1038_vm3, %v1039_v18  ;;  %v760_v21 = vpack.c.bf16 %v394_v17, %v393_v14  ;;  %p1376_p0 = scmp.ne.s32.totalorder %s1371_s17, 0  ;;  %s1040_s7 = smov [#allocation6]  }
 0x136   : > { %758 = vmatpush3.bf16.msra.mxu1 %v757_v16  ;;  %746 = vmatpush3.msk.msra.mxu0 %vm482_vm4, %v477_v19  ;;  %v390_v22 = vld [vmem:[%s1236_s15] sm:$0xff]  ;;  %s570_s11 = sadd.s32 %s1012_s24, %s764_s22  ;;  %s1375_s24 = sand.u32 1, %s992_s19  }
 0x137   : > { %759 = vmatprep.subr.bf16.mxu1 %v1037_v15  ;;  %v703_v25 = vld [vmem:[%s299_s13] ss:$0 sm:$0xff]  ;;  %s708_s9 = sshll.u32 %s570_s11, 7  ;;  %s559_s30 = scalar_lea.sflag [#allocation5], %s1375_s24 }
 0x138   : > { %s1281_s25 = scalar_lea.hbm %s1352_s5, %s708_s9  ;;  %s906_s13 = scalar_lea.vmem %s1283_s29, 128 }
 0x139   : > { %v476_v20 = vld [vmem:[#allocation2] sm:$0xff]  ;;  %p907_p4 = scmp.ne.s32.totalorder %s1283_s29, %s906_s13  ;;  %s910_s10 = sshll.u32 %s1040_s7, 4  ;;  %s911_s10 = int_to_ptr.vmem [resolvable:$false] %s910_s10 }
 0x13a   : > { %748 = vmatmul.mubr.msk.f32.vlgmr.msra.gmra.mrb[0].mxu0 %vm478_vm5, %v476_v20  ;;  %761 = vmatpush3.bf16.msra.mxu1 %v760_v21  ;;  %s912_s8 = scalar_lea.vmem %s911_s10, 256  ;;  %p913_p7 = scmp.lt.s32.totalorder %s1283_s29, %s911_s10 }
 0x13b   : > { %p908_p1 = pnand %p907_p4, %p1376_p0  ;;  %p914_p3 = scmp.lt.s32.totalorder %s912_s8, %s906_s13 }
 0x13d   : > { %743 = vmatmul.mubr.msk.f32.vlgmr.msra.gmra.mrb[0].mxu1 %vm402_vm6, %v390_v22  ;;  %p909_p5 = pneg %p908_p1  ;;  %p915_p10 = por %p914_p3, %p913_p7 }
 0x13f   : > { %p916_p11 = pnand %p915_p10, %p909_p5 }
 0x20d   : > { %v552_v23 = vpop.f32.mrb[0].mxu0 }
 0x20e   : > { %v749_v24 = vpop.f32.mrb[1].mxu0 }
 0x210   : > { %v472_v26 = vpop.f32.mrb[0].mxu1 }
 0x211   : > { %v473_v27 = vadd.f32 %v703_v25, %v472_v26  ;;  %v744_v28 = vpop.f32.mrb[1].mxu1 }
 0x213   : > { %v556_v29 = vadd.f32 %v552_v23, %v473_v27 }
 0x215   : > { %557 = vst [vmem:[%s292_s23] sm:$0xff] %v556_v29 }
 0x216   : > { %919 = shalt.err (!%p916_p11)
}
 0x217   : > { %s920_s23 = scalar_lea.hbm %s1281_s25, 128  ;;  %s924_s26 = scalar_lea.hbm %s1352_s5, 768 }
 0x218   : > { %p921_p6 = scmp.ne.s32.totalorder %s1281_s25, %s920_s23  ;;  %p925_p13 = scmp.lt.u32.totalorder %s1281_s25, %s1352_s5 }
 0x219   : > { %p926_p2 = scmp.lt.u32.totalorder %s924_s26, %s920_s23  ;;  %p928_p4 = scmp.lt.u32.totalorder %s920_s23, %s1281_s25 }
 0x21a   : > { %p922_p9 = pnand %p921_p6, %p1376_p0 }
 0x21b   : > { %p927_p8 = por %p926_p2, %p925_p13 }
 0x21c   : > { %p923_p12 = pneg %p922_p9 }
 0x21d   : > { %p929_p1 = por %p928_p4, %p927_p8 }
 0x21f   : > { %p930_p5 = pnand %p929_p1, %p923_p12 }
 0x221   : > { %933 = shalt.err (!%p930_p5)
}
 0x222   : > { %767 = dma.vmem_to_hbm [thread:$0]  (%p1376_p0), %s1283_s29, 128, %s1281_s25, %s559_s30  }
 0x223 PF: > { %p778_p7 = scmp.ge.s32.totalorder %s1028_s28, 2  ;;  %s586_s14 = sand.u32 1, %s988_s18  }
 0x224   : > { %p1377_p3 = scmp.ne.s32.totalorder %s1372_s21, 0  ;;  %s587_s27 = scalar_lea.sflag [#allocation5], %s586_s14 }
 0x226   : > { %p774_p10 = pnand %p778_p7, %p1377_p3 }
 0x228   : > { %983 = dma.done.wait (!%p774_p10), %s587_s27, 128  }
 0x229   : > { %985 = vsyncadd (!%p774_p10), %s587_s27, 4294967168  ;;  %s21_s28 = sadd.s32 1, %s1028_s28   ;;  %s1378_s21 = sld [smem:[#allocation9_spill]] }
 0x22a   : > { %p18_p11 = scmp.ge.s32.totalorder %s21_s28, 8   ;;  %s1379_s22 = sld [smem:[#allocation10_spill]] }
 0x22b   : > { %s1380_s23 = sld [smem:[#allocation15_spill]]  ;;  %s1381_s24 = sld [smem:[#allocation11_spill]] }
 0x22c   : > { %s1382_s25 = sld [smem:[#allocation12_spill]]  ;;  %s1383_s26 = sld [smem:[#allocation13_spill]] }
 0x22d   : > { %s1384_s27 = sld [smem:[#allocation14_spill]]  ;;  %s1385_s18 = smov %s992_s19 }
 0x22e   : > { %s1386_s19 = smov %s996_s20  ;;  %s1387_s20 = smov %s1159_s16 }
 0x22f   :  { %20 = sbr.rel (!%p18_p11) target bundleno = 11 (0xb), region = 98 }
 0x236   :  { %592 = vsyncpa [#allocation4], 1 }
 0x237   :  { %594 = vsyncpa [#allocation4 + $0x1], 1 }
 0x238   :  { %595 = vsyncpa [#allocation5], 1 }
 0x239   :  { %597 = vsyncpa [#allocation5 + $0x1], 1 }

</bundles_post_ra>
